<compile_context>
chip_gen: v7x
topology: tpu7x:2x2x1
jax: 0.10.0
libtpu: 0.0.40
codegen_flags: <defaults>
</compile_context>

<pallas_src>
import jax
import jax.numpy as jnp
from jax.experimental import pallas as pl
from jax.experimental.pallas import tpu as pltpu


def _label_smoothing_kernel(confidence: float, smooth_val: float, n_total: int):
    def kernel(pred_ref, tgt_ref, out_ref):
        pid = pl.program_id(0)
        tile_n, c = pred_ref.shape

        x = pred_ref[...].astype(jnp.float32)                     # (tile_n, C)

        # Row logsumexp (EUP exp/log; XLU lane reductions).
        m = jnp.max(x, axis=-1, keepdims=True)                    # (tile_n, 1)
        se = jnp.sum(jnp.exp(x - m), axis=-1, keepdims=True)
        z = m + jnp.log(se)                                       # logsumexp

        # Fused weighted lane reduction:
        #   sum_c(-true_dist_c * logp_c) = z - sum_c(w_c * x_c),  sum_c(w_c) == 1.
        cls_ids = jax.lax.broadcasted_iota(jnp.int32, (1, c), 1)  # (1, C)
        tgt = tgt_ref[...]                                        # (tile_n, 1) int32
        w = jnp.where(cls_ids == tgt,
                      jnp.float32(confidence), jnp.float32(smooth_val))
        wx = jnp.sum(w * x, axis=-1, keepdims=True)               # (tile_n, 1)
        per_row = z - wx

        # Mask only the per-row result for padded rows of the last partial tile
        # (true select: inf/NaN from stale padded rows is discarded).
        row_ids = pid * tile_n + jax.lax.broadcasted_iota(jnp.int32, (tile_n, 1), 0)
        per_row = jnp.where(row_ids < n_total, per_row, jnp.float32(0.0))

        # Lane-dense partial-sum block for this tile (wrapper reads [i, 0, 0]).
        out_ref[...] = jnp.full((1, 1, 128), jnp.sum(per_row), dtype=jnp.float32)

    return kernel


def label_smoothing_loss(pred: jax.Array, target: jax.Array, classes: int,
                         smoothing: float = 0.1, tile_n: int | None = None
                         ) -> jax.Array:
    """pred: (N, C) float (any dtype) logits, target: (N,) int labels -> scalar f32."""
    n, c = pred.shape
    assert c == classes
    confidence = 1.0 - smoothing
    smooth_val = smoothing / (classes - 1)

    # Row-tile choice: large enough that the per-step DMA dominates the ~0.35us
    # fixed grid-step overhead (HBM-roofline at large N), bounded by N and VMEM.
    if tile_n is None:
        tile_n = 4096
    tile_n = min(tile_n, n)
    if n >= 8:
        tile_n = max(8, ((tile_n + 7) // 8) * 8)  # sublane multiple
    # else: tile_n == n (< 8) -> single full-extent block, allowed by BlockSpec rules.
    grid_n = pl.cdiv(n, tile_n)

    target2d = target.astype(jnp.int32).reshape(n, 1)

    # VMEM budget: double-buffered pred tile + double-buffered target tile.
    # NOTE: the (tile_n, 1) int32 target block is lane-padded to 128 lanes in VMEM
    # (512 B/row); at very large tiles switch targets to a lane-dense (1, N) layout.
    padded_c = ((c + 127) // 128) * 128
    pred_buf = tile_n * padded_c * pred.dtype.itemsize
    tgt_buf = tile_n * 128 * 4
    vmem_limit = int(min(2 * (pred_buf + tgt_buf) + (8 << 20), 32 << 20))

    cost = pl.CostEstimate(
        flops=7 * n * c + 4 * n,
        transcendentals=n * c + n,
        bytes_accessed=n * c * pred.dtype.itemsize + n * 4 + grid_n * 512,
    )

    partials = pl.pallas_call(
        _label_smoothing_kernel(confidence, smooth_val, n),
        out_shape=jax.ShapeDtypeStruct((grid_n, 1, 128), jnp.float32),
        grid=(grid_n,),
        in_specs=[
            pl.BlockSpec((tile_n, c), lambda i: (i, 0)),      # pred tile
            pl.BlockSpec((tile_n, 1), lambda i: (i, 0)),      # target tile
        ],
        out_specs=pl.BlockSpec((1, 1, 128), lambda i: (i, 0, 0)),
        compiler_params=pltpu.CompilerParams(
            dimension_semantics=("parallel",),   # tiles independent -> megacore-shardable
            vmem_limit_bytes=vmem_limit,
        ),
        cost_estimate=cost,
    )(pred, target2d)

    # Final reduction of per-tile f32 partials in the wrapper (cheap, better numerics).
    return jnp.sum(partials[:, 0, 0]) / jnp.float32(n)


def _reference(pred, target, classes, smoothing=0.1):
    confidence = 1.0 - smoothing
    logp = jax.nn.log_softmax(pred.astype(jnp.float32), axis=-1)
    true_dist = jnp.full_like(logp, smoothing / (classes - 1))
    true_dist = true_dist.at[jnp.arange(pred.shape[0]), target].set(confidence)
    return jnp.mean(jnp.sum(-true_dist * logp, axis=-1))


if __name__ == "__main__":
    smoothing = 0.1
    C = 102  # Caltech101 classes

    key = jax.random.PRNGKey(0)
    k1, k2, k3, k4, k5, k6 = jax.random.split(key, 6)

    # Case 1: small batch, single tile (typical module use).
    N = 8
    pred = jax.random.normal(k1, (N, C), dtype=jnp.float32)
    target = jax.random.randint(k2, (N,), 0, C, dtype=jnp.int32)
    loss = jax.block_until_ready(
        label_smoothing_loss(pred, target, classes=C, smoothing=smoothing))
    ref = _reference(pred, target, C, smoothing)
    assert jnp.allclose(loss, ref, rtol=1e-4, atol=1e-4), (loss, ref)

    # Case 2: multi-tile grid with a masked partial last tile (N=20, tile=8 -> grid=3).
    N2 = 20
    pred2 = jax.random.normal(k3, (N2, C), dtype=jnp.float32)
    target2 = jax.random.randint(k4, (N2,), 0, C, dtype=jnp.int32)
    loss2 = jax.block_until_ready(
        label_smoothing_loss(pred2, target2, classes=C, smoothing=smoothing, tile_n=8))
    ref2 = _reference(pred2, target2, C, smoothing)
    assert jnp.allclose(loss2, ref2, rtol=1e-4, atol=1e-4), (loss2, ref2)

    # Case 3: bf16 logits stream in their native dtype (cast per tile in-kernel).
    N3 = 16
    pred3 = jax.random.normal(k5, (N3, C), dtype=jnp.bfloat16)
    target3 = jax.random.randint(k6, (N3,), 0, C, dtype=jnp.int32)
    loss3 = jax.block_until_ready(
        label_smoothing_loss(pred3, target3, classes=C, smoothing=smoothing))
    ref3 = _reference(pred3, target3, C, smoothing)
    assert jnp.allclose(loss3, ref3, rtol=1e-3, atol=1e-3), (loss3, ref3)

    print("KERNEL_OK")
</pallas_src>

<mosaic_0001>
module attributes {stable_mosaic.version = 11 : i64} {
  func.func @kernel(%arg0: i32, %arg1: memref<8x102xf32, #tpu.memory_space<vmem>>, %arg2: memref<8x1xi32, #tpu.memory_space<vmem>>, %arg3: memref<1x1x128xf32, #tpu.memory_space<vmem>>) attributes {dimension_semantics = [#tpu.dimension_semantics<parallel>], iteration_bounds = array<i64: 1>, scalar_prefetch = 0 : i64, scratch_operands = 0 : i64, tpu.core_type = #tpu.core_type<tc>, window_params = [{transform_indices = @transform_0, window_bounds = array<i64: 8, 102>}, {transform_indices = @transform_1, window_bounds = array<i64: 8, 1>}, {transform_indices = @transform_2, window_bounds = array<i64: 1, 1, 128>}]} {
    %c0 = arith.constant 0 : index
    %c0_0 = arith.constant 0 : index
    %0 = vector.load %arg1[%c0, %c0_0] : memref<8x102xf32, #tpu.memory_space<vmem>>, vector<8x102xf32>
    %cst = arith.constant dense<0xFF800000> : vector<8xf32>
    %1 = vector.multi_reduction <maximumf>, %0, %cst [1] : vector<8x102xf32> to vector<8xf32>
    %2 = vector.shape_cast %1 : vector<8xf32> to vector<8x1xf32>
    %3 = vector.broadcast %2 : vector<8x1xf32> to vector<8x102xf32>
    %4 = arith.subf %0, %3 : vector<8x102xf32>
    %5 = math.exp %4 : vector<8x102xf32>
    %cst_1 = arith.constant dense<0.000000e+00> : vector<8xf32>
    %6 = vector.multi_reduction <add>, %5, %cst_1 [1] : vector<8x102xf32> to vector<8xf32>
    %7 = vector.shape_cast %6 : vector<8xf32> to vector<8x1xf32>
    %8 = math.log %7 : vector<8x1xf32>
    %9 = arith.addf %2, %8 : vector<8x1xf32>
    %10 = tpu.iota {dimensions = array<i32: 1>} : vector<1x102xi32>
    %c0_2 = arith.constant 0 : index
    %c0_3 = arith.constant 0 : index
    %11 = vector.load %arg2[%c0_2, %c0_3] : memref<8x1xi32, #tpu.memory_space<vmem>>, vector<8x1xi32>
    %12 = vector.broadcast %10 : vector<1x102xi32> to vector<8x102xi32>
    %13 = vector.broadcast %11 : vector<8x1xi32> to vector<8x102xi32>
    %14 = arith.cmpi eq, %12, %13 : vector<8x102xi32>
    %cst_4 = arith.constant 0.899999976 : f32
    %cst_5 = arith.constant 9.900990e-04 : f32
    %15 = vector.broadcast %cst_4 : f32 to vector<8x102xf32>
    %16 = vector.broadcast %cst_5 : f32 to vector<8x102xf32>
    %17 = arith.select %14, %15, %16 : vector<8x102xi1>, vector<8x102xf32>
    %18 = arith.mulf %17, %0 : vector<8x102xf32>
    %cst_6 = arith.constant dense<0.000000e+00> : vector<8xf32>
    %19 = vector.multi_reduction <add>, %18, %cst_6 [1] : vector<8x102xf32> to vector<8xf32>
    %20 = vector.shape_cast %19 : vector<8xf32> to vector<8x1xf32>
    %21 = arith.subf %9, %20 : vector<8x1xf32>
    %c8_i32 = arith.constant 8 : i32
    %22 = arith.muli %arg0, %c8_i32 : i32
    %23 = tpu.iota {dimensions = array<i32: 0>} : vector<8x1xi32>
    %24 = vector.broadcast %22 : i32 to vector<8x1xi32>
    %25 = arith.addi %24, %23 : vector<8x1xi32>
    %c8_i32_7 = arith.constant 8 : i32
    %26 = vector.broadcast %c8_i32_7 : i32 to vector<8x1xi32>
    %27 = arith.cmpi slt, %25, %26 : vector<8x1xi32>
    %cst_8 = arith.constant 0.000000e+00 : f32
    %28 = vector.broadcast %cst_8 : f32 to vector<8x1xf32>
    %29 = arith.select %27, %21, %28 : vector<8x1xi1>, vector<8x1xf32>
    %30 = vector.shape_cast %29 : vector<8x1xf32> to vector<1x8x1xf32>
    %cst_9 = arith.constant dense<0.000000e+00> : vector<1xf32>
    %31 = vector.multi_reduction <add>, %30, %cst_9 [1, 2] : vector<1x8x1xf32> to vector<1xf32>
    %32 = vector.shape_cast %31 : vector<1xf32> to vector<1x1x1xf32>
    %33 = vector.extract %32[0, 0, 0] : f32 from vector<1x1x1xf32>
    %34 = vector.broadcast %33 : f32 to vector<1x1x128xf32>
    %c0_10 = arith.constant 0 : index
    %c0_11 = arith.constant 0 : index
    %c0_12 = arith.constant 0 : index
    %35 = vector.load %arg3[%c0_10, %c0_11, %c0_12] : memref<1x1x128xf32, #tpu.memory_space<vmem>>, vector<1x1x128xf32>
    tpu.vector_store %arg3[%c0_10, %c0_11, %c0_12], %34 {strides = array<i32>} : memref<1x1x128xf32, #tpu.memory_space<vmem>>, vector<1x1x128xf32>,
    return
  }
  func.func @transform_0(%arg0: i32) -> (i32, i32) {
    %c0_i32 = arith.constant 0 : i32
    %c0_i32_0 = arith.constant 0 : i32
    return %arg0, %c0_i32 : i32, i32
  }
  func.func @transform_1(%arg0: i32) -> (i32, i32) {
    %c0_i32 = arith.constant 0 : i32
    %c0_i32_0 = arith.constant 0 : i32
    return %arg0, %c0_i32 : i32, i32
  }
  func.func @transform_2(%arg0: i32) -> (i32, i32, i32) {
    %c0_i32 = arith.constant 0 : i32
    %c0_i32_0 = arith.constant 0 : i32
    %c0_i32_1 = arith.constant 0 : i32
    return %arg0, %c0_i32, %c0_i32_0 : i32, i32, i32
  }
}

</mosaic_0001>

<bundles_post_ra>
// kernel: tpu_custom_call.1
= control target key start
LH: loop header
LB: loop body
LE: loop exit
PB: predicated region body
PF: predicated region fallthrough
CT: control target
= control target key end

     0   :  { %vm13_vm0 = vcmask 834560   ;;  %s146_s0 = inlined_call_operand.vmem [shape: f32[8,102], index: 0, kind: input, shape index: {}]   ;;  %s147_s1 = inlined_call_operand.vmem [shape: s32[8,1], index: 1, kind: input, shape index: {}]   ;;  %s148_s2 = inlined_call_operand.hbm [shape: f32[1,1,128], index: 2, kind: output, shape index: {}]  }
   0x1   :  { %v12_v0 = vld [vmem:[%s146_s0] sm:$0xff] }
   0x2   :  { %7 = vsyncpa [#allocation3], 0  ;;  %v14_v1 = vsel %vm13_vm0, %v12_v0, -inf  ;;  %v107_v2 = vmov 0   ;;  %v28_v3 = vld [vmem:[%s147_s1] sm:$0xff]  ;;  %v26_v6 = vlaneseq  ;;  %vm46_vm2 = vcmask 7168  }
   0x3   :  { %78 = vset.pattern.permute.xlu0 %v107_v2  ;;  %v108_v10 = vmov 0.000990099   ;;  %s109_s0 = smov [#allocation2]  }
   0x4   :  { %15 = vmax.xlane.f32.xlu0 %v14_v1  ;;  %v27_v8 = vand.u32 127, %v26_v6  ;;  %s65_s1 = sshll.u32 %s109_s0, 4  ;;  %s66_s1 = int_to_ptr.vmem [resolvable:$true] %s65_s1 }
   0x5   :  { %s83_s14 = scalar_lea.vmem %s66_s1, 16  ;;  %s87_s15 = scalar_lea.vmem %s66_s1, 32 }
   0x6   :  { %p84_p0 = scmp.ne.s32.totalorder %s66_s1, %s83_s14  ;;  %p88_p1 = scmp.lt.s32.totalorder %s66_s1, %s66_s1 }
   0x7   :  { %p89_p2 = scmp.lt.s32.totalorder %s87_s15, %s83_s14 }
   0x9   :  { %p90_p3 = por %p89_p2, %p88_p1 }
   0xb   :  { %p91_p4 = pnand %p90_p3, %p84_p0 }
  0x1a   :  { %30 = vperm.xlu0 %78, %v28_v3  }
  0x91   :  { %v16_v4 = vpop.xlane.xlu0 %15 }
  0x92   :  { %v17_v5 = vsub.f32 %v12_v0, %v16_v4 }
  0x94   :  { %v18_v7 = vmul.f32 1.442695, %v17_v5 }
  0x96   :  { %79 = vpow2.f32 %v18_v7 }
  0x99   :  { %v31_v9 = vpop.permute.xlu0 %30 }
  0x9a   :  { %vm32_vm1 = vcmp.eq.s32.totalorder %v27_v8, %v31_v9 }
  0x9b   :  { %v33_v11 = vsel %vm32_vm1, 0.9, %v108_v10 }
  0x9c   :  { %v34_v12 = vmul.f32 %v33_v11, %v12_v0 }
  0x9e   :  { %v35_v15 = vsel %vm13_vm0, %v34_v12, 0.0 }
  0xa0   :  { %v80_v13 = vpop.eup %79 }
  0xa1   :  { %v20_v14 = vsel %vm13_vm0, %v80_v13, 0.0 }
  0xa2   :  { %21 = vadd.xlane.f32.xlu1 %v20_v14 }
  0xa6   :  { %36 = vadd.xlane.f32.xlu1 %v35_v15 }
 0x12f   :  { %v22_v16 = vpop.xlane.xlu1 %21 }
 0x130   :  { %81 = vlog2.f32 %v22_v16 }
 0x133   :  { %v37_v19 = vpop.xlane.xlu1 %36 }
 0x13a   :  { %v82_v17 = vpop.eup %81 }
 0x13b   :  { %v24_v18 = vmul.f32 0.6931472, %v82_v17 }
 0x13d   :  { %v25_v20 = vadd.f32 %v24_v18, %v16_v4 }
 0x13f   :  { %v38_v21 = vsub.f32 %v25_v20, %v37_v19 }
 0x141   :  { %v47_v22 = vsel %vm46_vm2, %v38_v21, 0.0 }
 0x142   :  { %48 = vadd.xlane.f32.xlu1 %v47_v22 }
 0x1cf   :  { %v49_v23 = vpop.xlane.xlu1 %48 }
 0x1d0   :  { %v50_v24 = vrot.slane %v49_v23, 4 }
 0x1d2   :  { %v51_v25 = vadd.f32 %v50_v24, %v49_v23 }
 0x1d4   :  { %v52_v26 = vrot.slane %v51_v25, 2 }
 0x1d6   :  { %v53_v27 = vadd.f32 %v52_v26, %v51_v25 }
 0x1d8   :  { %v54_v28 = vrot.slane %v53_v27, 1 }
 0x1da   :  { %v55_v29 = vadd.f32 %v54_v28, %v53_v27 }
 0x1dc   :  { %73 = vpush %v55_v29 }
 0x20d   :  { %s74_s13 = spop %73 }
 0x20e   :  { %v57_v30 = vstv %s74_s13 }
 0x20f   :  { %58 = vst [vmem:[#allocation2] sm:$0x1] %v57_v30 }
 0x210   :  { %94 = shalt.err (!%p91_p4)
}
 0x211   :  { %s95_s18 = scalar_lea.hbm %s148_s2, 16 }
 0x212   :  { %p96_p5 = scmp.ne.s32.totalorder %s148_s2, %s95_s18  ;;  %p99_p6 = scmp.lt.u32.totalorder %s95_s18, %s148_s2 }
 0x214   :  { %p101_p7 = pnand %p99_p6, %p96_p5 }
 0x216   :  { %104 = shalt.err (!%p101_p7)
}
 0x217   :  { %68 = dma.vmem_to_hbm [thread:$0]  %s66_s1, 16, %s148_s2, [#allocation3]  }
 0x218   :  { %105 = dma.done.wait [#allocation3], 16  }
 0x219   :  { %106 = vsyncadd [#allocation3], 4294967280 }
 0x21a   :  { %72 = vsyncpa [#allocation3], 1 }

</bundles_post_ra>
